<compile_context>
chip_gen: v7x
topology: tpu7x:2x2x1
jax: 0.10.0
libtpu: 0.0.40
codegen_flags: <defaults>
</compile_context>

<pallas_src>
import jax
import jax.numpy as jnp
from jax.experimental import pallas as pl
from jax.experimental.pallas import tpu as pltpu


# --------------------------------------------------------------------------- #
# Helpers
# --------------------------------------------------------------------------- #
def _round_up(x, m):
    return ((x + m - 1) // m) * m


def _vmem_capacity_bytes():
    """Per-TensorCore VMEM capacity; conservative fallback if query fails."""
    try:
        cap = int(pltpu.get_tpu_info().vmem_capacity_bytes)
        if cap > 0:
            return cap
    except Exception:
        pass
    return 64 * 1024 * 1024        # v7x per-TC size == safe lower bound everywhere


# --------------------------------------------------------------------------- #
# Kernel
# --------------------------------------------------------------------------- #
def _gmu4_kernel(x1_ref, x2_ref, x3_ref, x4_ref,
                 wc1_ref, wc2_ref, wc3_ref, wc4_ref,
                 comb_ref):
    """One batch-tile of the 4-way gated multimodal unit.

    wc_i  : [in_i, 5*so_p] = [gate cols for z1..z4 | hidden cols], so_p%128==0
    comb  : [tile, 5*so_p] = [z1 | z2 | z3 | z4 | out]  (lane-dense stores)
    """
    f32 = jnp.float32
    so_p = comb_ref.shape[-1] // 5
    gcols = 4 * so_p

    # One wide MXU pass per modality: gate partials + hidden pre-activation.
    y1 = jnp.dot(x1_ref[...], wc1_ref[...], preferred_element_type=f32)
    y2 = jnp.dot(x2_ref[...], wc2_ref[...], preferred_element_type=f32)
    y3 = jnp.dot(x3_ref[...], wc3_ref[...], preferred_element_type=f32)
    y4 = jnp.dot(x4_ref[...], wc4_ref[...], preferred_element_type=f32)

    # Gate = x_cat @ G_cat^T accumulated per modality; sigmoid via ONE EUP tanh.
    gate = (y1[:, :gcols] + y2[:, :gcols]) + (y3[:, :gcols] + y4[:, :gcols])
    z_all = 0.5 * jnp.tanh(0.5 * gate) + 0.5                 # == sigmoid(gate)
    comb_ref[:, :gcols] = z_all.astype(comb_ref.dtype)       # lane-aligned store

    # out = sum_i z_i * tanh(h_i); all slices are lane-tile aligned.
    acc = z_all[:, 0 * so_p:1 * so_p] * jnp.tanh(y1[:, gcols:])
    acc = acc + z_all[:, 1 * so_p:2 * so_p] * jnp.tanh(y2[:, gcols:])
    acc = acc + z_all[:, 2 * so_p:3 * so_p] * jnp.tanh(y3[:, gcols:])
    acc = acc + z_all[:, 3 * so_p:4 * so_p] * jnp.tanh(y4[:, gcols:])
    comb_ref[:, gcols:] = acc.astype(comb_ref.dtype)          # lane-aligned store


# --------------------------------------------------------------------------- #
# One-time weight preparation
# --------------------------------------------------------------------------- #
def prepare_params(params, in_sizes, *, compute_dtype=jnp.bfloat16):
    """Build one fused weight matrix per modality.

    params: PyTorch-layout weights ([out, in]):
        w1..w4 : [size_out, in_i]          (hidden_i)
        g1..g4 : [size_out, sum(in_sizes)] (x{i}_gate)
    Returns a dict with wc1..wc4 of shape [in_i, 5*so_p] in `compute_dtype`,
    where so_p = round_up(size_out, 128) and the extra columns are zero.
    """
    size_out = int(params["w1"].shape[0])
    so_p = _round_up(size_out, 128)

    def pad_cols(m):                                   # [rows, size_out] -> [rows, so_p]
        return jnp.pad(m, ((0, 0), (0, so_p - size_out)))

    gts = [jnp.asarray(params[f"g{j + 1}"], jnp.float32).T for j in range(4)]  # [Kcat, out]

    prepared = {
        "size_out": size_out,
        "so_p": so_p,
        "in_sizes": tuple(int(s) for s in in_sizes),
        "compute_dtype": compute_dtype,
    }
    off = 0
    for i, s in enumerate(in_sizes):
        blocks = [pad_cols(g[off:off + s, :]) for g in gts]                # gate cols
        blocks.append(pad_cols(jnp.asarray(params[f"w{i + 1}"], jnp.float32).T))  # hidden
        prepared[f"wc{i + 1}"] = jnp.concatenate(blocks, axis=1).astype(compute_dtype)
        off += s
    return prepared


# --------------------------------------------------------------------------- #
# Tile sizing
# --------------------------------------------------------------------------- #
def _choose_batch_tile(batch, in_sizes, so_p, act_bytes):
    cap = _vmem_capacity_bytes()
    budget = int(cap * 0.70)                     # per-TC budget with headroom
    k_total = sum(in_sizes)
    gran = 16 if act_bytes < 4 else 8
    out_bytes = 4                                # outputs stay float32

    weight_bytes = 2 * k_total * 5 * so_p * act_bytes        # (conservatively 2x)
    per_row = (2 * k_total * act_bytes                        # dbl-buffered acts
               + 2 * 5 * so_p * out_bytes                     # dbl-buffered output
               + 10 * so_p * 4)                               # live f32 intermediates
    avail = budget - weight_bytes
    if avail < per_row * gran:
        # TODO(synk): add a K/N reduction grid axis for configs whose resident
        # weights exceed the VMEM budget instead of failing here.
        raise ValueError(
            f"Resident weights ({weight_bytes / 2**20:.1f} MiB) exceed the "
            f"{budget / 2**20:.1f} MiB VMEM budget; K/N tiling required.")

    tile = int(avail // per_row)
    tile = max(gran, min(tile, 1024))
    # Keep >=2 grid steps when the batch allows it (feeds both v7x TensorCores).
    half = max(gran, _round_up((batch + 1) // 2, gran))
    tile = min(tile, half, _round_up(batch, gran))
    tile = max(gran, (tile // gran) * gran)
    return tile


# --------------------------------------------------------------------------- #
# Forward wrapper
# --------------------------------------------------------------------------- #
def text_shifting4_forward(xs, prepared, *, batch_tile=None):
    """xs: tuple of 4 arrays [B, in_i].  Returns (out [B, size_out],
    z [B, 4*size_out]) in float32."""
    compute_dtype = prepared["compute_dtype"]
    size_out = prepared["size_out"]
    so_p = prepared["so_p"]
    in_sizes = prepared["in_sizes"]
    assert tuple(int(x.shape[1]) for x in xs) == in_sizes, "input feature dims mismatch"

    xs = tuple(jnp.asarray(x).astype(compute_dtype) for x in xs)
    batch = int(xs[0].shape[0])
    k_total = sum(in_sizes)
    act_bytes = jnp.dtype(compute_dtype).itemsize
    gran = 16 if act_bytes < 4 else 8

    if batch_tile is None:
        batch_tile = _choose_batch_tile(batch, in_sizes, so_p, act_bytes)
    batch_tile = min(batch_tile, _round_up(batch, gran))
    batch_tile = max(gran, (batch_tile // gran) * gran)

    b_pad = _round_up(batch, batch_tile)
    if b_pad != batch:
        xs = tuple(jnp.pad(x, ((0, b_pad - batch), (0, 0))) for x in xs)

    grid = (b_pad // batch_tile,)
    gcols = 4 * so_p

    in_specs = [pl.BlockSpec((batch_tile, s), lambda i: (i, 0)) for s in in_sizes]
    in_specs += [pl.BlockSpec(prepared[f"wc{i + 1}"].shape, lambda i: (0, 0))
                 for i in range(4)]
    out_specs = pl.BlockSpec((batch_tile, 5 * so_p), lambda i: (i, 0))
    out_shape = jax.ShapeDtypeStruct((b_pad, 5 * so_p), jnp.float32)

    cap = _vmem_capacity_bytes()
    vmem_limit = min(int(cap * 0.9), 100 * 1024 * 1024)

    cost = pl.CostEstimate(
        flops=int(2 * b_pad * k_total * 5 * so_p),
        transcendentals=int(8 * b_pad * so_p),
        bytes_accessed=int(b_pad * k_total * act_bytes
                           + b_pad * 5 * so_p * 4
                           + k_total * 5 * so_p * act_bytes),
    )

    comb = pl.pallas_call(
        _gmu4_kernel,
        grid=grid,
        in_specs=in_specs,
        out_specs=out_specs,
        out_shape=out_shape,
        compiler_params=pltpu.CompilerParams(
            dimension_semantics=("parallel",),
            vmem_limit_bytes=vmem_limit),
        cost_estimate=cost,
    )(*xs, prepared["wc1"], prepared["wc2"], prepared["wc3"], prepared["wc4"])

    # Strip batch padding and the zero-padded output columns (cheap XLA slices).
    z = comb[:batch, :gcols].reshape(batch, 4, so_p)[:, :, :size_out]
    z = z.reshape(batch, 4 * size_out)
    out = comb[:batch, gcols:gcols + size_out]
    return out, z


# --------------------------------------------------------------------------- #
# Init + pure-JAX references
# --------------------------------------------------------------------------- #
def init_params(key, size_in1, size_in2, size_in3, size_in4, size_out):
    """nn.Linear-style U(-1/sqrt(fan_in), 1/sqrt(fan_in)) init, PyTorch layout."""
    sizes_in = (size_in1, size_in2, size_in3, size_in4)
    size_cat = sum(sizes_in)
    names = ["w1", "w2", "w3", "w4", "g1", "g2", "g3", "g4"]
    fan_ins = list(sizes_in) + [size_cat] * 4
    keys = jax.random.split(key, len(names))
    params = {}
    for name, fan_in, k in zip(names, fan_ins, keys):
        bound = 1.0 / (fan_in ** 0.5)
        params[name] = jax.random.uniform(
            k, (size_out, fan_in), jnp.float32, minval=-bound, maxval=bound)
    return params


def reference_forward(xs, params):
    """Mirrors the PyTorch forward exactly (float32)."""
    x1, x2, x3, x4 = xs
    h1 = jnp.tanh(x1 @ params["w1"].T)
    h2 = jnp.tanh(x2 @ params["w2"].T)
    h3 = jnp.tanh(x3 @ params["w3"].T)
    h4 = jnp.tanh(x4 @ params["w4"].T)
    xc = jnp.concatenate(xs, axis=-1)
    z1 = jax.nn.sigmoid(xc @ params["g1"].T)
    z2 = jax.nn.sigmoid(xc @ params["g2"].T)
    z3 = jax.nn.sigmoid(xc @ params["g3"].T)
    z4 = jax.nn.sigmoid(xc @ params["g4"].T)
    return (z1 * h1 + z2 * h2 + z3 * h3 + z4 * h4,
            jnp.concatenate([z1, z2, z3, z4], axis=-1))


def _quantize(params, xs, dtype):
    """Round params/activations to `dtype` and lift back to f32 (bf16 reference)."""
    q = lambda a: jnp.asarray(a, jnp.float32).astype(dtype).astype(jnp.float32)
    return {k: q(v) for k, v in params.items()}, tuple(q(x) for x in xs)


# --------------------------------------------------------------------------- #
# Self-test
# --------------------------------------------------------------------------- #
if __name__ == "__main__":
    key = jax.random.PRNGKey(0)
    k_p, k1, k2, k3, k4 = jax.random.split(key, 5)

    batch = 8
    size_in = (16, 24, 32, 40)
    size_out = 32

    params = init_params(k_p, *size_in, size_out)
    xs = tuple(jax.random.normal(k, (batch, s), jnp.float32)
               for k, s in zip((k1, k2, k3, k4), size_in))

    # 1) f32 compute path: exact semantics vs. PyTorch-style reference.
    prep_f32 = prepare_params(params, size_in, compute_dtype=jnp.float32)
    out32, z32 = jax.block_until_ready(text_shifting4_forward(xs, prep_f32))
    ref_out, ref_z = reference_forward(xs, params)
    assert out32.shape == (batch, size_out)
    assert z32.shape == (batch, 4 * size_out)
    assert jnp.allclose(out32, ref_out, atol=3e-5, rtol=3e-5)
    assert jnp.allclose(z32, ref_z, atol=3e-5, rtol=3e-5)

    # 2) Default bf16 compute path (MXU-native) vs. bf16-quantised reference.
    prep_bf16 = prepare_params(params, size_in)          # compute_dtype=bfloat16
    out16, z16 = jax.block_until_ready(text_shifting4_forward(xs, prep_bf16))
    q_params, q_xs = _quantize(params, xs, jnp.bfloat16)
    qref_out, qref_z = reference_forward(q_xs, q_params)
    assert out16.shape == (batch, size_out)
    assert z16.shape == (batch, 4 * size_out)
    assert jnp.allclose(out16, qref_out, atol=2e-3, rtol=2e-3)
    assert jnp.allclose(z16, qref_z, atol=2e-3, rtol=2e-3)

    print("KERNEL_OK")
</pallas_src>

<mosaic_0001>
module attributes {stable_mosaic.version = 11 : i64} {
  func.func @_gmu4_kernel(%arg0: i32, %arg1: memref<8x16xf32, #tpu.memory_space<vmem>>, %arg2: memref<8x24xf32, #tpu.memory_space<vmem>>, %arg3: memref<8x32xf32, #tpu.memory_space<vmem>>, %arg4: memref<8x40xf32, #tpu.memory_space<vmem>>, %arg5: memref<16x640xf32, #tpu.memory_space<vmem>>, %arg6: memref<24x640xf32, #tpu.memory_space<vmem>>, %arg7: memref<32x640xf32, #tpu.memory_space<vmem>>, %arg8: memref<40x640xf32, #tpu.memory_space<vmem>>, %arg9: memref<8x640xf32, #tpu.memory_space<vmem>>) attributes {dimension_semantics = [#tpu.dimension_semantics<parallel>], iteration_bounds = array<i64: 1>, scalar_prefetch = 0 : i64, scratch_operands = 0 : i64, tpu.core_type = #tpu.core_type<tc>, window_params = [{transform_indices = @transform_0, window_bounds = array<i64: 8, 16>}, {transform_indices = @transform_1, window_bounds = array<i64: 8, 24>}, {transform_indices = @transform_2, window_bounds = array<i64: 8, 32>}, {transform_indices = @transform_3, window_bounds = array<i64: 8, 40>}, {pipeline_mode = #tpu.pipeline_mode<synchronous>, transform_indices = @transform_4, window_bounds = array<i64: 16, 640>}, {pipeline_mode = #tpu.pipeline_mode<synchronous>, transform_indices = @transform_5, window_bounds = array<i64: 24, 640>}, {pipeline_mode = #tpu.pipeline_mode<synchronous>, transform_indices = @transform_6, window_bounds = array<i64: 32, 640>}, {pipeline_mode = #tpu.pipeline_mode<synchronous>, transform_indices = @transform_7, window_bounds = array<i64: 40, 640>}, {transform_indices = @transform_8, window_bounds = array<i64: 8, 640>}]} {
    %c0 = arith.constant 0 : index
    %c0_0 = arith.constant 0 : index
    %0 = vector.load %arg1[%c0, %c0_0] : memref<8x16xf32, #tpu.memory_space<vmem>>, vector<8x16xf32>
    %c0_1 = arith.constant 0 : index
    %c0_2 = arith.constant 0 : index
    %1 = vector.load %arg5[%c0_1, %c0_2] : memref<16x640xf32, #tpu.memory_space<vmem>>, vector<16x640xf32>
    %cst = arith.constant dense<0.000000e+00> : vector<8x640xf32>
    %2 = tpu.matmul %0, %1, %cst {dimension_numbers = #tpu.dot_dimension_numbers<[1], [0], [0], [1], [0, 0, 1, 1], [], []>} : vector<8x16xf32>, vector<16x640xf32>, vector<8x640xf32> -> vector<8x640xf32>
    %c0_3 = arith.constant 0 : index
    %c0_4 = arith.constant 0 : index
    %3 = vector.load %arg2[%c0_3, %c0_4] : memref<8x24xf32, #tpu.memory_space<vmem>>, vector<8x24xf32>
    %c0_5 = arith.constant 0 : index
    %c0_6 = arith.constant 0 : index
    %4 = vector.load %arg6[%c0_5, %c0_6] : memref<24x640xf32, #tpu.memory_space<vmem>>, vector<24x640xf32>
    %cst_7 = arith.constant dense<0.000000e+00> : vector<8x640xf32>
    %5 = tpu.matmul %3, %4, %cst_7 {dimension_numbers = #tpu.dot_dimension_numbers<[1], [0], [0], [1], [0, 0, 1, 1], [], []>} : vector<8x24xf32>, vector<24x640xf32>, vector<8x640xf32> -> vector<8x640xf32>
    %c0_8 = arith.constant 0 : index
    %c0_9 = arith.constant 0 : index
    %6 = vector.load %arg3[%c0_8, %c0_9] : memref<8x32xf32, #tpu.memory_space<vmem>>, vector<8x32xf32>
    %c0_10 = arith.constant 0 : index
    %c0_11 = arith.constant 0 : index
    %7 = vector.load %arg7[%c0_10, %c0_11] : memref<32x640xf32, #tpu.memory_space<vmem>>, vector<32x640xf32>
    %cst_12 = arith.constant dense<0.000000e+00> : vector<8x640xf32>
    %8 = tpu.matmul %6, %7, %cst_12 {dimension_numbers = #tpu.dot_dimension_numbers<[1], [0], [0], [1], [0, 0, 1, 1], [], []>} : vector<8x32xf32>, vector<32x640xf32>, vector<8x640xf32> -> vector<8x640xf32>
    %c0_13 = arith.constant 0 : index
    %c0_14 = arith.constant 0 : index
    %9 = vector.load %arg4[%c0_13, %c0_14] : memref<8x40xf32, #tpu.memory_space<vmem>>, vector<8x40xf32>
    %c0_15 = arith.constant 0 : index
    %c0_16 = arith.constant 0 : index
    %10 = vector.load %arg8[%c0_15, %c0_16] : memref<40x640xf32, #tpu.memory_space<vmem>>, vector<40x640xf32>
    %cst_17 = arith.constant dense<0.000000e+00> : vector<8x640xf32>
    %11 = tpu.matmul %9, %10, %cst_17 {dimension_numbers = #tpu.dot_dimension_numbers<[1], [0], [0], [1], [0, 0, 1, 1], [], []>} : vector<8x40xf32>, vector<40x640xf32>, vector<8x640xf32> -> vector<8x640xf32>
    %12 = vector.extract_strided_slice %2 {offsets = [0, 0], sizes = [8, 512], strides = [1, 1]} : vector<8x640xf32> to vector<8x512xf32>
    %13 = vector.extract_strided_slice %5 {offsets = [0, 0], sizes = [8, 512], strides = [1, 1]} : vector<8x640xf32> to vector<8x512xf32>
    %14 = arith.addf %12, %13 : vector<8x512xf32>
    %15 = vector.extract_strided_slice %8 {offsets = [0, 0], sizes = [8, 512], strides = [1, 1]} : vector<8x640xf32> to vector<8x512xf32>
    %16 = vector.extract_strided_slice %11 {offsets = [0, 0], sizes = [8, 512], strides = [1, 1]} : vector<8x640xf32> to vector<8x512xf32>
    %17 = arith.addf %15, %16 : vector<8x512xf32>
    %18 = arith.addf %14, %17 : vector<8x512xf32>
    %cst_18 = arith.constant 5.000000e-01 : f32
    %19 = vector.broadcast %cst_18 : f32 to vector<8x512xf32>
    %20 = arith.mulf %19, %18 : vector<8x512xf32>
    %21 = math.tanh %20 : vector<8x512xf32>
    %cst_19 = arith.constant 5.000000e-01 : f32
    %22 = vector.broadcast %cst_19 : f32 to vector<8x512xf32>
    %23 = arith.mulf %22, %21 : vector<8x512xf32>
    %cst_20 = arith.constant 5.000000e-01 : f32
    %24 = vector.broadcast %cst_20 : f32 to vector<8x512xf32>
    %25 = arith.addf %23, %24 : vector<8x512xf32>
    %c0_21 = arith.constant 0 : index
    %c0_22 = arith.constant 0 : index
    %26 = vector.load %arg9[%c0_21, %c0_22] : memref<8x640xf32, #tpu.memory_space<vmem>>, vector<8x512xf32>
    tpu.vector_store %arg9[%c0_21, %c0_22], %25 {strides = array<i32>} : memref<8x640xf32, #tpu.memory_space<vmem>>, vector<8x512xf32>,
    %27 = vector.extract_strided_slice %25 {offsets = [0, 0], sizes = [8, 128], strides = [1, 1]} : vector<8x512xf32> to vector<8x128xf32>
    %28 = vector.extract_strided_slice %2 {offsets = [0, 512], sizes = [8, 128], strides = [1, 1]} : vector<8x640xf32> to vector<8x128xf32>
    %29 = math.tanh %28 : vector<8x128xf32>
    %30 = arith.mulf %27, %29 : vector<8x128xf32>
    %31 = vector.extract_strided_slice %25 {offsets = [0, 128], sizes = [8, 128], strides = [1, 1]} : vector<8x512xf32> to vector<8x128xf32>
    %32 = vector.extract_strided_slice %5 {offsets = [0, 512], sizes = [8, 128], strides = [1, 1]} : vector<8x640xf32> to vector<8x128xf32>
    %33 = math.tanh %32 : vector<8x128xf32>
    %34 = arith.mulf %31, %33 : vector<8x128xf32>
    %35 = arith.addf %30, %34 : vector<8x128xf32>
    %36 = vector.extract_strided_slice %25 {offsets = [0, 256], sizes = [8, 128], strides = [1, 1]} : vector<8x512xf32> to vector<8x128xf32>
    %37 = vector.extract_strided_slice %8 {offsets = [0, 512], sizes = [8, 128], strides = [1, 1]} : vector<8x640xf32> to vector<8x128xf32>
    %38 = math.tanh %37 : vector<8x128xf32>
    %39 = arith.mulf %36, %38 : vector<8x128xf32>
    %40 = arith.addf %35, %39 : vector<8x128xf32>
    %41 = vector.extract_strided_slice %25 {offsets = [0, 384], sizes = [8, 128], strides = [1, 1]} : vector<8x512xf32> to vector<8x128xf32>
    %42 = vector.extract_strided_slice %11 {offsets = [0, 512], sizes = [8, 128], strides = [1, 1]} : vector<8x640xf32> to vector<8x128xf32>
    %43 = math.tanh %42 : vector<8x128xf32>
    %44 = arith.mulf %41, %43 : vector<8x128xf32>
    %45 = arith.addf %40, %44 : vector<8x128xf32>
    %c0_23 = arith.constant 0 : index
    %c512 = arith.constant 512 : index
    %46 = vector.load %arg9[%c0_23, %c512] : memref<8x640xf32, #tpu.memory_space<vmem>>, vector<8x128xf32>
    tpu.vector_store %arg9[%c0_23, %c512], %45 {strides = array<i32>} : memref<8x640xf32, #tpu.memory_space<vmem>>, vector<8x128xf32>,
    return
  }
  func.func @transform_0(%arg0: i32) -> (i32, i32) {
    %c0_i32 = arith.constant 0 : i32
    %c0_i32_0 = arith.constant 0 : i32
    return %arg0, %c0_i32 : i32, i32
  }
  func.func @transform_1(%arg0: i32) -> (i32, i32) {
    %c0_i32 = arith.constant 0 : i32
    %c0_i32_0 = arith.constant 0 : i32
    return %arg0, %c0_i32 : i32, i32
  }
  func.func @transform_2(%arg0: i32) -> (i32, i32) {
    %c0_i32 = arith.constant 0 : i32
    %c0_i32_0 = arith.constant 0 : i32
    return %arg0, %c0_i32 : i32, i32
  }
  func.func @transform_3(%arg0: i32) -> (i32, i32) {
    %c0_i32 = arith.constant 0 : i32
    %c0_i32_0 = arith.constant 0 : i32
    return %arg0, %c0_i32 : i32, i32
  }
  func.func @transform_4(%arg0: i32) -> (i32, i32) {
    %c0_i32 = arith.constant 0 : i32
    %c0_i32_0 = arith.constant 0 : i32
    %c0_i32_1 = arith.constant 0 : i32
    return %c0_i32, %c0_i32_0 : i32, i32
  }
  func.func @transform_5(%arg0: i32) -> (i32, i32) {
    %c0_i32 = arith.constant 0 : i32
    %c0_i32_0 = arith.constant 0 : i32
    %c0_i32_1 = arith.constant 0 : i32
    return %c0_i32, %c0_i32_0 : i32, i32
  }
  func.func @transform_6(%arg0: i32) -> (i32, i32) {
    %c0_i32 = arith.constant 0 : i32
    %c0_i32_0 = arith.constant 0 : i32
    %c0_i32_1 = arith.constant 0 : i32
    return %c0_i32, %c0_i32_0 : i32, i32
  }
  func.func @transform_7(%arg0: i32) -> (i32, i32) {
    %c0_i32 = arith.constant 0 : i32
    %c0_i32_0 = arith.constant 0 : i32
    %c0_i32_1 = arith.constant 0 : i32
    return %c0_i32, %c0_i32_0 : i32, i32
  }
  func.func @transform_8(%arg0: i32) -> (i32, i32) {
    %c0_i32 = arith.constant 0 : i32
    %c0_i32_0 = arith.constant 0 : i32
    return %arg0, %c0_i32 : i32, i32
  }
}

</mosaic_0001>

<bundles_post_ra>
// kernel: tpu_custom_call.1
= control target key start
LH: loop header
LB: loop body
LE: loop exit
PB: predicated region body
PF: predicated region fallthrough
CT: control target
= control target key end

     0   :  { %13 = vsyncpa [#allocation3], 0  ;;  %s1701_s0 = inlined_call_operand.hbm [shape: f32[8,16], index: 0, kind: input, shape index: {}]   ;;  %s1702_s1 = inlined_call_operand.hbm [shape: f32[8,24], index: 1, kind: input, shape index: {}]   ;;  %s1703_s2 = inlined_call_operand.hbm [shape: f32[8,32], index: 2, kind: input, shape index: {}]   ;;  %s1704_s3 = inlined_call_operand.vmem [shape: f32[8,40], index: 3, kind: input, shape index: {}]   ;;  %s1705_s4 = inlined_call_operand.hbm [shape: f32[16,640], index: 4, kind: input, shape index: {}]   ;;  %s1706_s5 = inlined_call_operand.hbm [shape: f32[24,640], index: 5, kind: input, shape index: {}]   ;;  %s1707_s6 = inlined_call_operand.hbm [shape: f32[32,640], index: 6, kind: input, shape index: {}]   ;;  %s1708_s7 = inlined_call_operand.hbm [shape: f32[40,640], index: 7, kind: input, shape index: {}]   ;;  %s1709_s8 = inlined_call_operand.hbm [shape: f32[8,640], index: 8, kind: output, shape index: {}]  }
   0x1   :  { %14 = vsyncpa [#allocation6], 0 }
   0x2   :  { %15 = vsyncpa [#allocation9], 0 }
   0x3   :  { %16 = vsyncpa [#allocation12], 0 }
   0x4   :  { %17 = vsyncpa [#allocation4], 0  ;;  %s1482_s27 = smov [#allocation5]   ;;  %s1483_s29 = smov [#allocation8]  }
   0x5   :  { %s34_s28 = sshll.u32 %s1482_s27, 4  ;;  %s55_s30 = sshll.u32 %s1483_s29, 4  ;;  %s35_s28 = int_to_ptr.vmem [resolvable:$true] %s34_s28  ;;  %s1540_s30 = int_to_ptr.vmem [resolvable:$true] %s55_s30 }
   0x6   :  { %s1296_s11 = scalar_lea.hbm %s1702_s1, 128 }
   0x7   :  { %p1297_p0 = scmp.ne.s32.totalorder %s1702_s1, %s1296_s11  ;;  %p1300_p1 = scmp.lt.u32.totalorder %s1296_s11, %s1702_s1 }
   0x9   :  { %p1302_p2 = pnand %p1300_p1, %p1297_p0 }
   0xb   :  { %1305 = shalt.err (!%p1302_p2)
}
   0xc   :  { %s1306_s16 = scalar_lea.vmem %s35_s28, 128  ;;  %p1311_p4 = scmp.lt.s32.totalorder %s35_s28, %s35_s28 }
   0xd   :  { %p1307_p3 = scmp.ne.s32.totalorder %s35_s28, %s1306_s16  ;;  %p1312_p5 = scmp.lt.s32.totalorder %s1306_s16, %s1306_s16 }
   0xf   :  { %p1313_p6 = por %p1312_p5, %p1311_p4 }
  0x11   :  { %p1314_p7 = pnand %p1313_p6, %p1307_p3 }
  0x13   :  { %1317 = shalt.err (!%p1314_p7)
}
  0x14   :  { %37 = dma.hbm_to_vmem [thread:$0]  %s1702_s1, 128, %s35_s28, [#allocation6]  }
  0x15   :  { %s1318_s21 = scalar_lea.hbm %s1705_s4, 1280 }
  0x16   :  { %p1319_p8 = scmp.ne.s32.totalorder %s1705_s4, %s1318_s21  ;;  %p1322_p9 = scmp.lt.u32.totalorder %s1318_s21, %s1705_s4 }
  0x18   :  { %p1324_p10 = pnand %p1322_p9, %p1319_p8 }
  0x1a   :  { %1327 = shalt.err (!%p1324_p10)
}
  0x1b   :  { %s1328_s26 = scalar_lea.vmem %s1540_s30, 1280  ;;  %p1333_p12 = scmp.lt.s32.totalorder %s1540_s30, %s1540_s30 }
  0x1c   :  { %p1329_p11 = scmp.ne.s32.totalorder %s1540_s30, %s1328_s26  ;;  %p1334_p13 = scmp.lt.s32.totalorder %s1328_s26, %s1328_s26 }
  0x1e   :  { %p1335_p0 = por %p1334_p13, %p1333_p12 }
  0x20   :  { %p1336_p1 = pnand %p1335_p0, %p1329_p11 }
  0x22   :  { %1339 = shalt.err (!%p1336_p1)
}
  0x23   :  { %s1484_s1 = smov 640   ;;  %s1485_s27 = smov 40  }
  0x24   :  { %61 = dma.hbm_to_vmem [thread:$0]  %s1705_s4, 1280, %s1540_s30, [#allocation9], %s1484_s1, %s1484_s1, %s1485_s27  }
  0x25   :  { %s1486_s9 = smov [#allocation11]   ;;  %s1487_s11 = smov [#allocation2]  }
  0x26   :  { %s79_s10 = sshll.u32 %s1486_s9, 4  ;;  %s24_s12 = sshll.u32 %s1487_s11, 4  ;;  %s80_s10 = int_to_ptr.vmem [resolvable:$true] %s79_s10  ;;  %s25_s12 = int_to_ptr.vmem [resolvable:$true] %s24_s12 }
  0x27   :  { %s1340_s15 = scalar_lea.hbm %s1707_s6, 2560 }
  0x28   :  { %p1341_p2 = scmp.ne.s32.totalorder %s1707_s6, %s1340_s15  ;;  %p1344_p3 = scmp.lt.u32.totalorder %s1340_s15, %s1707_s6 }
  0x2a   :  { %p1346_p4 = pnand %p1344_p3, %p1341_p2 }
  0x2c   :  { %1349 = shalt.err (!%p1346_p4)
}
  0x2d   :  { %s1350_s4 = scalar_lea.vmem %s80_s10, 2560  ;;  %p1355_p6 = scmp.lt.s32.totalorder %s80_s10, %s80_s10 }
  0x2e   :  { %p1351_p5 = scmp.ne.s32.totalorder %s80_s10, %s1350_s4  ;;  %p1356_p7 = scmp.lt.s32.totalorder %s1350_s4, %s1350_s4 }
  0x30   :  { %p1357_p8 = por %p1356_p7, %p1355_p6 }
  0x32   :  { %p1358_p9 = pnand %p1357_p8, %p1351_p5 }
  0x34   :  { %1361 = shalt.err (!%p1358_p9)
}
  0x35   :  { %85 = dma.hbm_to_vmem [thread:$0]  %s1707_s6, 2560, %s80_s10, [#allocation12], %s1484_s1, %s1484_s1, %s1485_s27  }
  0x36   :  { %s1362_s23 = scalar_lea.hbm %s1701_s0, 128 }
  0x37   :  { %p1363_p10 = scmp.ne.s32.totalorder %s1701_s0, %s1362_s23  ;;  %p1366_p11 = scmp.lt.u32.totalorder %s1362_s23, %s1701_s0 }
  0x39   :  { %p1368_p12 = pnand %p1366_p11, %p1363_p10 }
  0x3b   :  { %1371 = shalt.err (!%p1368_p12)
}
  0x3c   :  { %s1372_s29 = scalar_lea.vmem %s25_s12, 128  ;;  %p1377_p0 = scmp.lt.s32.totalorder %s25_s12, %s25_s12 }
  0x3d   :  { %p1373_p13 = scmp.ne.s32.totalorder %s25_s12, %s1372_s29  ;;  %p1378_p1 = scmp.lt.s32.totalorder %s1372_s29, %s1372_s29 }
  0x3f   :  { %p1379_p2 = por %p1378_p1, %p1377_p0 }
  0x41   :  { %p1380_p3 = pnand %p1379_p2, %p1373_p13 }
  0x43   :  { %1383 = shalt.err (!%p1380_p3)
}
  0x44   :  { %27 = dma.hbm_to_vmem [thread:$0]  %s1701_s0, 128, %s25_s12, [#allocation3]  }
  0x45   :  { %s1488_s10 = smov [#allocation7]   ;;  %s1489_s13 = smov [#allocation10]  }
  0x46   :  { %s44_s11 = sshll.u32 %s1488_s10, 4  ;;  %s67_s14 = sshll.u32 %s1489_s13, 4  ;;  %s45_s11 = int_to_ptr.vmem [resolvable:$true] %s44_s11  ;;  %s1601_s14 = int_to_ptr.vmem [resolvable:$true] %s67_s14 }
  0x47   :  { %s1384_s17 = scalar_lea.hbm %s1703_s2, 128 }
  0x48   :  { %p1385_p4 = scmp.ne.s32.totalorder %s1703_s2, %s1384_s17  ;;  %p1388_p5 = scmp.lt.u32.totalorder %s1384_s17, %s1703_s2 }
  0x4a   :  { %p1390_p6 = pnand %p1388_p5, %p1385_p4 }
  0x4c   :  { %1393 = shalt.err (!%p1390_p6)
}
  0x4d   :  { %s1394_s0 = scalar_lea.vmem %s45_s11, 128  ;;  %p1399_p8 = scmp.lt.s32.totalorder %s45_s11, %s45_s11 }
  0x4e   :  { %p1395_p7 = scmp.ne.s32.totalorder %s45_s11, %s1394_s0  ;;  %p1400_p9 = scmp.lt.s32.totalorder %s1394_s0, %s1394_s0 }
  0x50   :  { %p1401_p10 = por %p1400_p9, %p1399_p8 }
  0x52   :  { %p1402_p11 = pnand %p1401_p10, %p1395_p7 }
  0x54   :  { %1405 = shalt.err (!%p1402_p11)
}
  0x55   :  { %47 = dma.hbm_to_vmem [thread:$0]  %s1703_s2, 128, %s45_s11, [#allocation6]  }
  0x56   :  { %s1406_s23 = scalar_lea.hbm %s1706_s5, 1920 }
  0x57   :  { %p1407_p12 = scmp.ne.s32.totalorder %s1706_s5, %s1406_s23  ;;  %p1410_p13 = scmp.lt.u32.totalorder %s1406_s23, %s1706_s5 }
  0x59   :  { %p1412_p0 = pnand %p1410_p13, %p1407_p12 }
  0x5b   :  { %1415 = shalt.err (!%p1412_p0)
}
  0x5c   :  { %s1416_s29 = scalar_lea.vmem %s1601_s14, 1920  ;;  %p1421_p2 = scmp.lt.s32.totalorder %s1601_s14, %s1601_s14 }
  0x5d   :  { %p1417_p1 = scmp.ne.s32.totalorder %s1601_s14, %s1416_s29  ;;  %p1422_p3 = scmp.lt.s32.totalorder %s1416_s29, %s1416_s29 }
  0x5f   :  { %p1423_p4 = por %p1422_p3, %p1421_p2 }
  0x61   :  { %p1424_p5 = pnand %p1423_p4, %p1417_p1 }
  0x63   :  { %1427 = shalt.err (!%p1424_p5)
}
  0x64   :  { %73 = dma.hbm_to_vmem [thread:$0]  %s1706_s5, 1920, %s1601_s14, [#allocation9], %s1484_s1, %s1484_s1, %s1485_s27  }
  0x65   :  { %s1490_s9 = smov [#allocation13]   ;;  %s1428_s15 = scalar_lea.hbm %s1708_s7, 3200 }
  0x66   :  { %s91_s10 = sshll.u32 %s1490_s9, 4  ;;  %p1429_p6 = scmp.ne.s32.totalorder %s1708_s7, %s1428_s15  ;;  %s92_s10 = int_to_ptr.vmem [resolvable:$true] %s91_s10 }
  0x67   :  { %p1432_p7 = scmp.lt.u32.totalorder %s1428_s15, %s1708_s7 }
  0x69   :  { %p1434_p8 = pnand %p1432_p7, %p1429_p6 }
  0x6b   :  { %1437 = shalt.err (!%p1434_p8)
}
  0x6c   :  { %s1438_s4 = scalar_lea.vmem %s92_s10, 3200  ;;  %p1443_p10 = scmp.lt.s32.totalorder %s92_s10, %s92_s10 }
  0x6d   :  { %p1439_p9 = scmp.ne.s32.totalorder %s92_s10, %s1438_s4  ;;  %p1444_p11 = scmp.lt.s32.totalorder %s1438_s4, %s1438_s4 }
  0x6f   :  { %p1445_p12 = por %p1444_p11, %p1443_p10 }
  0x71   :  { %p1446_p13 = pnand %p1445_p12, %p1439_p9 }
  0x73   :  { %1449 = shalt.err (!%p1446_p13)
}
  0x74   :  { %97 = dma.hbm_to_vmem [thread:$0]  %s1708_s7, 3200, %s92_s10, [#allocation12], %s1484_s1, %s1484_s1, %s1485_s27  }
  0x75   :  { %1472 = dma.done.wait [#allocation3], 128  }
  0x76   :  { %1473 = vsyncadd [#allocation3], 4294967168 }
  0x77   :  { %1474 = dma.done.wait [#allocation6], 256  }
  0x78   :  { %1475 = vsyncadd [#allocation6], 4294967040 }
  0x79   :  { %1476 = dma.done.wait [#allocation9], 3200  }
  0x7a   :  { %1477 = vsyncadd [#allocation9], 4294964096 }
  0x7b   :  { %1478 = dma.done.wait [#allocation12], 5760  }
  0x7c   :  { %1479 = vsyncadd [#allocation12], 4294961536  ;;  %v1491_v0 = vmov 0.0   ;;  %v121_v1 = vld [vmem:[#allocation8 + $0x8] sm:$0xff]  ;;  %v126_v2 = vld [vmem:[#allocation8 + $0x30] sm:$0xff]  ;;  %vm130_vm0 = vcmask 130048  }
  0x7d   :  { %198 = vmatprep.mubr.f32.mxu0 %v1491_v0  ;;  %269 = vmatprep.mubr.f32.mxu1 %v1491_v0  ;;  %v123_v3 = vld [vmem:[#allocation8 + $0x18] sm:$0xff]  ;;  %v1189_v4 = vpack.c.bf16 %v126_v2, %v121_v1  ;;  %v128_v5 = vld [vmem:[#allocation8 + $0x40] sm:$0xff]  ;;  %v125_v7 = vld [vmem:[#allocation8 + $0x28] sm:$0xff]  ;;  %v1492_v21 = vmov 0.0|0.0   ;;  %vm1493_vm1 = vmmov 0   ;;  %vm362_vm2 = vcmask 195584  }
  0x7e   :  { %v120_v6 = vld [vmem:[#allocation8] sm:$0xff]  ;;  %v1193_v8 = vpack.c.bf16 %v128_v5, %v123_v3  ;;  %v122_v10 = vld [vmem:[#allocation8 + $0x10] sm:$0xff]  ;;  %v127_v11 = vld [vmem:[#allocation8 + $0x38] sm:$0xff]  ;;  %vm599_vm3 = vcmask 261120   ;;  %vm841_vm4 = vcmask 326656  }
  0x7f   :  { %v1191_v9 = vpack.c.bf16 %v125_v7, %v120_v6  ;;  %v119_v12 = vld [vmem:[#allocation2] sm:$0xff]  ;;  %1190 = vmatprep.subr.bf16.mxu0 %v1189_v4  ;;  %v1195_v13 = vpack.c.bf16 %v127_v11, %v122_v10  ;;  %v124_v14 = vld [vmem:[#allocation8 + $0x20] sm:$0xff]  ;;  %v355_v18 = vld [vmem:[#allocation10 + $0x40] sm:$0xff] }
  0x80   :  { %v129_v15 = vld [vmem:[#allocation8 + $0x48] sm:$0xff]  ;;  %1194 = vmatprep.subr.bf16.mxu1 %v1193_v8  ;;  %v349_v19 = vld [vmem:[#allocation10 + $0x10] sm:$0xff]  ;;  %v348_v24 = vld [vmem:[#allocation10 + $0x8] sm:$0xff] }
  0x81   :  { %v350_v16 = vld [vmem:[#allocation10 + $0x18] sm:$0xff]  ;;  %1192 = vmatpush1.bf16.msra.mxu0 %v1191_v9  ;;  %v1198_v17 = vpack.c.bf16 %v129_v15, %v124_v14  ;;  %1196 = vmatpush1.bf16.msra.mxu1 %v1195_v13  ;;  %v353_v25 = vld [vmem:[#allocation10 + $0x30] sm:$0xff]  ;;  %v347_v26 = vld [vmem:[#allocation10] sm:$0xff] }
  0x82   :  { %v354_v20 = vld [vmem:[#allocation10 + $0x38] sm:$0xff]  ;;  %1197 = vmatprep.subr.bf16.mxu0 %v1492_v21  ;;  %v1204_v22 = vpack.c.bf16 %v355_v18, %v350_v16  ;;  %v1200_v27 = vpack.c.bf16 %v353_v25, %v348_v24  ;;  %v352_v28 = vld [vmem:[#allocation10 + $0x28] sm:$0xff]  ;;  %v359_v31 = vld [vmem:[#allocation10 + $0x60] sm:$0xff] }
  0x83   :  { %v1206_v23 = vpack.c.bf16 %v354_v20, %v349_v19  ;;  %v360_v29 = vld [vmem:[#allocation10 + $0x68] sm:$0xff]  ;;  %v1202_v30 = vpack.c.bf16 %v352_v28, %v347_v26  ;;  %v358_v32 = vld [vmem:[#allocation10 + $0x58] sm:$0xff]  ;;  %v351_v33 = vld [vmem:[#allocation10 + $0x20] sm:$0xff] }
  0x84   :  { %1119 = vmatmul.mubr.msk.f32.vlgmr.msra.gmra.mrb[0].mxu0 %vm130_vm0, %v119_v12  ;;  %1205 = vmatprep.subr.bf16.mxu1 %v1204_v22  ;;  %v356_v34 = vld [vmem:[#allocation10 + $0x48] sm:$0xff]  ;;  %v580_v35 = vld [vmem:[#allocation11 + $0x8] sm:$0xff]  ;;  %v579_v38 = vld [vmem:[#allocation11] sm:$0xff] }
  0x85   :  { %1120 = vmatmul.mubr.msk.f32.vlgmr.msra.gmra.mrb[0].mxu1 %vm130_vm0, %v119_v12  ;;  %1199 = vmatpush3.bf16.msra.mxu0 %v1198_v17  ;;  %v585_v36 = vld [vmem:[#allocation11 + $0x30] sm:$0xff]  ;;  %v346_v37 = vld [vmem:[#allocation5] sm:$0xff]  ;;  %v1209_v40 = vpack.c.bf16 %v356_v34, %v351_v33  ;;  %v357_v41 = vld [vmem:[#allocation10 + $0x50] sm:$0xff] }
  0x86   :  { %1207 = vmatpush1.bf16.msra.mxu1 %v1206_v23  ;;  %1153 = vmatprep.mubr.msk.f32.mxu0 %vm1493_vm1, %v1491_v0  ;;  %v584_v39 = vld [vmem:[#allocation11 + $0x28] sm:$0xff]  ;;  %v1211_v42 = vpack.c.bf16 %v585_v36, %v580_v35  ;;  %v590_v43 = vld [vmem:[#allocation11 + $0x58] sm:$0xff]  ;;  %v595_v44 = vld [vmem:[#allocation11 + $0x80] sm:$0xff] }
  0x87   :  { %1201 = vmatprep.subr.bf16.mxu0 %v1200_v27  ;;  %441 = vmatprep.subr.mxu1 %v360_v29  ;;  %v1213_v45 = vpack.c.bf16 %v584_v39, %v579_v38  ;;  %v582_v46 = vld [vmem:[#allocation11 + $0x18] sm:$0xff]  ;;  %v587_v47 = vld [vmem:[#allocation11 + $0x40] sm:$0xff]  ;;  %v581_v48 = vld [vmem:[#allocation11 + $0x10] sm:$0xff]  ;;  %v1215_v49 = vpack.c.bf16 %v595_v44, %v590_v43 }
  0x88   :  { %1154 = vmatmul.mubr.msk.f32.vlgmr.msra.gmra.mrb[2].mxu0 %vm130_vm0, %v119_v12  ;;  %501 = vmatprep.mubr.f32.mxu1 %v1491_v0  ;;  %v586_v50 = vld [vmem:[#allocation11 + $0x38] sm:$0xff]  ;;  %v589_v51 = vld [vmem:[#allocation11 + $0x50] sm:$0xff]  ;;  %v592_v53 = vld [vmem:[#allocation11 + $0x68] sm:$0xff]  ;;  %v1219_v56 = vpack.c.bf16 %v587_v47, %v582_v46 }
  0x89   :  { %1203 = vmatpush1.bf16.msra.mxu0 %v1202_v30  ;;  %430 = vmatprep.mubr.f32.mxu0 %v1491_v0  ;;  %v594_v52 = vld [vmem:[#allocation11 + $0x78] sm:$0xff]  ;;  %v597_v54 = vld [vmem:[#allocation11 + $0x90] sm:$0xff]  ;;  %v1221_v57 = vpack.c.bf16 %v586_v50, %v581_v48  ;;  %v591_v59 = vld [vmem:[#allocation11 + $0x60] sm:$0xff] }
  0x8a   :  { %442 = vmatpush1.msra.mxu1 %v359_v31  ;;  %370 = vmatprep.subr.mxu0 %v358_v32  ;;  %v361_v55 = vld [vmem:[#allocation10 + $0x70] sm:$0xff]  ;;  %v1217_v58 = vpack.c.bf16 %v594_v52, %v589_v51  ;;  %v1223_v60 = vpack.c.bf16 %v597_v54, %v592_v53  ;;  %v596_v61 = vld [vmem:[#allocation11 + $0x88] sm:$0xff]  ;;  %v583_v62 = vld [vmem:[#allocation11 + $0x20] sm:$0xff] }
  0x8b   :  { %1208 = vmatprep.subr.bf16.mxu1 %v1492_v21  ;;  %v588_v63 = vld [vmem:[#allocation11 + $0x48] sm:$0xff]  ;;  %v819_v1 = vld [vmem:[#allocation13 + $0x18] sm:$0xff]  ;;  %v824_v2 = vld [vmem:[#allocation13 + $0x40] sm:$0xff]  ;;  %v1225_v3 = vpack.c.bf16 %v596_v61, %v591_v59 }
  0x8c   :  { %v578_v4 = vld [vmem:[#allocation7] sm:$0xff]  ;;  %v1228_v5 = vpack.c.bf16 %v588_v63, %v583_v62  ;;  %v823_v7 = vld [vmem:[#allocation13 + $0x38] sm:$0xff]  ;;  %v1241_v8 = vpack.c.bf16 %v824_v2, %v819_v1  ;;  %v829_v11 = vld [vmem:[#allocation13 + $0x68] sm:$0xff] }
  0x8d   :  { %1123 = vmatmul.mubr.msk.f32.vlgmr.msra.gmra.mrb[0].mxu1 %vm362_vm2, %v346_v37  ;;  %371 = vmatpush1.msra.mxu0 %v357_v41  ;;  %v818_v6 = vld [vmem:[#allocation13 + $0x10] sm:$0xff]  ;;  %v598_v10 = vld [vmem:[#allocation11 + $0x98] sm:$0xff]  ;;  %v817_v13 = vld [vmem:[#allocation13 + $0x8] sm:$0xff] }
  0x8e   :  { %1210 = vmatpush3.bf16.msra.mxu1 %v1209_v40  ;;  %1212 = vmatprep.subr.bf16.mxu0 %v1211_v42  ;;  %v593_v9 = vld [vmem:[#allocation11 + $0x70] sm:$0xff]  ;;  %v1243_v15 = vpack.c.bf16 %v823_v7, %v818_v6  ;;  %v828_v17 = vld [vmem:[#allocation13 + $0x60] sm:$0xff]  ;;  %v833_v20 = vld [vmem:[#allocation13 + $0x88] sm:$0xff] }
  0x8f   :  { %1122 = vmatmul.mubr.msk.f32.vlgmr.msra.gmra.mrb[0].mxu0 %vm362_vm2, %v346_v37  ;;  %1160 = vmatprep.subr.mxu1 %v1491_v0  ;;  %v834_v12 = vld [vmem:[#allocation13 + $0x90] sm:$0xff]  ;;  %v1231_v16 = vpack.c.bf16 %v598_v10, %v593_v9  ;;  %v816_v22 = vld [vmem:[#allocation13] sm:$0xff]  ;;  %v821_v23 = vld [vmem:[#allocation13 + $0x28] sm:$0xff]  ;;  %v1247_v26 = vpack.c.bf16 %v833_v20, %v828_v17 }
  0x90   :  { %1214 = vmatpush1.bf16.msra.mxu0 %v1213_v45  ;;  %1162 = vmatprep.mubr.msk.f32.mxu1 %vm1493_vm1, %v1491_v0  ;;  %v822_v14 = vld [vmem:[#allocation13 + $0x30] sm:$0xff]  ;;  %v1245_v18 = vpack.c.bf16 %v834_v12, %v829_v11  ;;  %v827_v24 = vld [vmem:[#allocation13 + $0x58] sm:$0xff]  ;;  %v832_v25 = vld [vmem:[#allocation13 + $0x80] sm:$0xff]  ;;  %v1235_v27 = vpack.c.bf16 %v821_v23, %v816_v22 }
  0x91   :  { %1216 = vmatprep.subr.bf16.mxu0 %v1215_v49  ;;  %667 = vmatprep.mubr.f32.mxu0 %v1491_v0  ;;  %v1233_v19 = vpack.c.bf16 %v822_v14, %v817_v13  ;;  %v1237_v28 = vpack.c.bf16 %v832_v25, %v827_v24  ;;  %v826_v29 = vld [vmem:[#allocation13 + $0x50] sm:$0xff]  ;;  %v831_v30 = vld [vmem:[#allocation13 + $0x78] sm:$0xff]  ;;  %v820_v32 = vld [vmem:[#allocation13 + $0x20] sm:$0xff] }
  0x92   :  { %1161 = vmatpush3.msra.mxu1 %v361_v55  ;;  %v839_v31 = vld [vmem:[#allocation13 + $0xb8] sm:$0xff]  ;;  %v825_v33 = vld [vmem:[#allocation13 + $0x48] sm:$0xff]  ;;  %v1239_v34 = vpack.c.bf16 %v831_v30, %v826_v29  ;;  %v838_v35 = vld [vmem:[#allocation13 + $0xb0] sm:$0xff] }
  0x93   :  { %1220 = vmatprep.subr.bf16.mxu1 %v1219_v56  ;;  %1163 = vmatmul.mubr.msk.f32.vlgmr.msra.gmra.mrb[2].mxu1 %vm362_vm2, %v346_v37  ;;  %v815_v36 = vld [vmem:[%s1704_s3] sm:$0xff]  ;;  %v1250_v37 = vpack.c.bf16 %v825_v33, %v820_v32  ;;  %v837_v38 = vld [vmem:[#allocation13 + $0xa8] sm:$0xff]  ;;  %v830_v39 = vld [vmem:[#allocation13 + $0x70] sm:$0xff]  ;;  %s1494_s3 = smov [#allocation14]  }
  0x94   :  { %1222 = vmatpush1.bf16.msra.mxu1 %v1221_v57  ;;  %1218 = vmatpush1.bf16.msra.mxu0 %v1217_v58  ;;  %v835_v40 = vld [vmem:[#allocation13 + $0x98] sm:$0xff]  ;;  %v836_v41 = vld [vmem:[#allocation13 + $0xa0] sm:$0xff]  ;;  %s1107_s27 = sshll.u32 %s1494_s3, 4  ;;  %s1108_s27 = int_to_ptr.vmem [resolvable:$true] %s1107_s27 }
  0x95   :  { %1224 = vmatprep.subr.bf16.mxu1 %v1223_v60  ;;  %1227 = vmatprep.subr.bf16.mxu0 %v1492_v21  ;;  %v1253_v42 = vpack.c.bf16 %v835_v40, %v830_v39  ;;  %v840_v43 = vld [vmem:[#allocation13 + $0xc0] sm:$0xff]  ;;  %s1450_s30 = scalar_lea.vmem %s1108_s27, 640  ;;  %p1455_p1 = scmp.lt.s32.totalorder %s1108_s27, %s1108_s27 }
  0x96   :  { %738 = vmatprep.mubr.f32.mxu1 %v1491_v0  ;;  %p1451_p0 = scmp.ne.s32.totalorder %s1108_s27, %s1450_s30  ;;  %p1456_p2 = scmp.lt.s32.totalorder %s1450_s30, %s1450_s30 }
  0x97   :  { %1125 = vmatmul.mubr.msk.f32.vlgmr.msra.gmra.mrb[0].mxu0 %vm599_vm3, %v578_v4 }
  0x98   :  { %1226 = vmatpush1.bf16.msra.mxu1 %v1225_v3  ;;  %1229 = vmatpush3.bf16.msra.mxu0 %v1228_v5  ;;  %p1457_p3 = por %p1456_p2, %p1455_p1 }
  0x99   :  { %1242 = vmatprep.subr.bf16.mxu1 %v1241_v8  ;;  %1230 = vmatprep.subr.bf16.mxu0 %v1492_v21 }
  0x9a   :  { %1173 = vmatprep.mubr.msk.f32.mxu0 %vm1493_vm1, %v1491_v0  ;;  %p1458_p4 = pnand %p1457_p3, %p1451_p0 }
  0x9b   :  { %1126 = vmatmul.mubr.msk.f32.vlgmr.msra.gmra.mrb[0].mxu1 %vm599_vm3, %v578_v4 }
  0x9c   :  { %1244 = vmatpush1.bf16.msra.mxu1 %v1243_v15  ;;  %1232 = vmatpush3.bf16.msra.mxu0 %v1231_v16 }
  0x9d   :  { %1246 = vmatprep.subr.bf16.mxu1 %v1245_v18  ;;  %1234 = vmatprep.subr.bf16.mxu0 %v1233_v19 }
  0x9e   :  { %980 = vmatprep.mubr.f32.mxu1 %v1491_v0 }
  0x9f   :  { %1174 = vmatmul.mubr.msk.f32.vlgmr.msra.gmra.mrb[4].mxu0 %vm599_vm3, %v578_v4 }
  0xa0   :  { %1248 = vmatpush1.bf16.msra.mxu1 %v1247_v26  ;;  %1236 = vmatpush1.bf16.msra.mxu0 %v1235_v27 }
  0xa1   :  { %924 = vmatprep.subr.mxu1 %v839_v31  ;;  %1238 = vmatprep.subr.bf16.mxu0 %v1237_v28 }
  0xa2   :  { %909 = vmatprep.mubr.f32.mxu0 %v1491_v0 }
  0xa4   :  { %925 = vmatpush1.msra.mxu1 %v838_v35  ;;  %1240 = vmatpush1.bf16.msra.mxu0 %v1239_v34 }
  0xa5   :  { %1129 = vmatmul.mubr.msk.f32.vlgmr.msra.gmra.mrb[0].mxu1 %vm841_vm4, %v815_v36  ;;  %1249 = vmatprep.subr.bf16.mxu1 %v1492_v21 }
  0xa6   :  { %1251 = vmatpush3.bf16.msra.mxu1 %v1250_v37  ;;  %853 = vmatprep.subr.mxu0 %v837_v38 }
  0xa7   :  { %1252 = vmatprep.subr.bf16.mxu1 %v1492_v21  ;;  %1186 = vmatprep.mubr.msk.f32.mxu1 %vm1493_vm1, %v1491_v0 }
  0xa8   :  { %854 = vmatpush1.msra.mxu0 %v836_v41 }
  0xa9   :  { %1128 = vmatmul.mubr.msk.f32.vlgmr.msra.gmra.mrb[0].mxu0 %vm841_vm4, %v815_v36 }
  0xaa   :  { %1254 = vmatpush3.bf16.msra.mxu1 %v1253_v42 }
  0xab   :  { %1184 = vmatprep.subr.mxu1 %v1491_v0 }
  0xae   :  { %1185 = vmatpush3.msra.mxu1 %v840_v43 }
  0xaf   :  { %1187 = vmatmul.mubr.msk.f32.vlgmr.msra.gmra.mrb[4].mxu1 %vm841_vm4, %v815_v36 }
 0x15b   :  { %v342_v44 = vpop.f32.mrb[2].mxu0 }
 0x15c   :  { %v1155_v45 = vpop.f32.mrb[3].mxu0 }
 0x166   :  { %v574_v46 = vpop.f32.mrb[2].mxu1 }
 0x167   :  { %v1164_v47 = vpop.f32.mrb[3].mxu1 }
 0x172   :  { %v811_v48 = vpop.f32.mrb[4].mxu0 }
 0x173   :  { %v1175_v49 = vpop.f32.mrb[5].mxu0 }
 0x178   :  { %v982_v21 = vpop.f32.mrb[0].mxu1 }
 0x179   :  { %v1071_v50 = vmul.f32 0.5, %v982_v21  ;;  %v984_v51 = vpop.f32.mrb[1].mxu1 }
 0x17a   :  { %v1072_v52 = vmul.f32 0.5, %v984_v51 }
 0x17b   :  { %1280 = vtanh.f32 %v1071_v50 }
 0x17c   :  { %1282 = vtanh.f32 %v1072_v52  ;;  %v911_v53 = vpop.f32.mrb[0].mxu0 }
 0x17d   :  { %v1069_v54 = vmul.f32 0.5, %v911_v53  ;;  %v913_v55 = vpop.f32.mrb[1].mxu0  ;;  %1284 = vtanh.f32 %v811_v48 }
 0x17e   :  { %v1070_v0 = vmul.f32 0.5, %v913_v55 }
 0x17f   :  { %1286 = vtanh.f32 %v1069_v54 }
 0x180   :  { %1288 = vtanh.f32 %v1070_v0 }
 0x181   :  { %1290 = vtanh.f32 %v342_v44 }
 0x182   :  { %v1053_v56 = vpop.f32.mrb[4].mxu1 }
 0x183   :  { %1292 = vtanh.f32 %v1053_v56  ;;  %v1188_v57 = vpop.f32.mrb[5].mxu1 }
 0x184   :  { %1294 = vtanh.f32 %v574_v46 }
 0x185   :  { %v1281_v58 = vpop.eup %1280 }
 0x186   :  { %v1283_v59 = vpop.eup %1282  ;;  %v1079_v60 = vmul.f32 0.5, %v1281_v58 }
 0x187   :  { %v1080_v61 = vmul.f32 0.5, %v1283_v59  ;;  %v1285_v62 = vpop.eup %1284 }
 0x188   :  { %v1083_v63 = vadd.f32 0.5, %v1079_v60 }
 0x189   :  { %v1287_v1 = vpop.eup %1286  ;;  %v1084_v2 = vadd.f32 0.5, %v1080_v61 }
 0x18a   :  { %v1289_v3 = vpop.eup %1288  ;;  %1087 = vst [vmem:[#allocation14 + $0x10] sm:$0xff] %v1083_v63  ;;  %v1095_v4 = vmul.f32 %v1285_v62, %v1083_v63  ;;  %v1077_v5 = vmul.f32 0.5, %v1287_v1 }
 0x18b   :  { %1088 = vst [vmem:[#allocation14 + $0x18] sm:$0xff] %v1084_v2  ;;  %v1078_v6 = vmul.f32 0.5, %v1289_v3  ;;  %v1291_v7 = vpop.eup %1290 }
 0x18c   :  { %v1081_v8 = vadd.f32 0.5, %v1077_v5 }
 0x18d   :  { %v1293_v9 = vpop.eup %1292  ;;  %v1082_v10 = vadd.f32 0.5, %v1078_v6 }
 0x18e   :  { %v1295_v11 = vpop.eup %1294  ;;  %1085 = vst [vmem:[#allocation14] sm:$0xff] %v1081_v8  ;;  %v1090_v12 = vmul.f32 %v1291_v7, %v1081_v8  ;;  %v1098_v13 = vmul.f32 %v1293_v9, %v1084_v2 }
 0x18f   :  { %1086 = vst [vmem:[#allocation14 + $0x8] sm:$0xff] %v1082_v10  ;;  %v1092_v14 = vmul.f32 %v1295_v11, %v1082_v10 }
 0x191   :  { %v1093_v15 = vadd.f32 %v1092_v14, %v1090_v12 }
 0x193   :  { %v1096_v16 = vadd.f32 %v1095_v4, %v1093_v15 }
 0x195   :  { %v1099_v17 = vadd.f32 %v1098_v13, %v1096_v16 }
 0x197   :  { %1100 = vst [vmem:[#allocation14 + $0x20] sm:$0xff] %v1099_v17 }
 0x198   :  { %1461 = shalt.err (!%p1458_p4)
}
 0x199   :  { %s1462_s20 = scalar_lea.hbm %s1709_s8, 640 }
 0x19a   :  { %p1463_p5 = scmp.ne.s32.totalorder %s1709_s8, %s1462_s20  ;;  %p1466_p6 = scmp.lt.u32.totalorder %s1462_s20, %s1709_s8 }
 0x19c   :  { %p1468_p7 = pnand %p1466_p6, %p1463_p5 }
 0x19e   :  { %1471 = shalt.err (!%p1468_p7)
}
 0x19f   :  { %1110 = dma.vmem_to_hbm [thread:$0]  %s1108_s27, 640, %s1709_s8, [#allocation4]  }
 0x1a0   :  { %1480 = dma.done.wait [#allocation4], 640  }
 0x1a1   :  { %1481 = vsyncadd [#allocation4], 4294966656 }
 0x1a2   :  { %1114 = vsyncpa [#allocation3], 1 }
 0x1a3   :  { %1115 = vsyncpa [#allocation6], 1 }
 0x1a4   :  { %1116 = vsyncpa [#allocation9], 1 }
 0x1a5   :  { %1117 = vsyncpa [#allocation12], 1 }
 0x1a6   :  { %1118 = vsyncpa [#allocation4], 1 }

</bundles_post_ra>
